<compile_context>
chip_gen: v6e
topology: v6e:2x2x1
jax: 0.10.0
libtpu: 0.0.40
codegen_flags: <defaults>
</compile_context>

<pallas_src>
import jax
import jax.numpy as jnp
from jax.experimental import pallas as pl
from jax.experimental.pallas import tpu as pltpu


def digit_sum_kernel(x_ref, s_ref, wpr1_ref, br1_ref, wr3t_ref, br3_ref, out_ref):
    # x_ref   : (TB*N_pad, 1) int32 digit ids for this batch tile (sentinel -1 = padding)
    # s_ref   : (TB, TB*N_pad) f32 block-diagonal summation matrix (per-set segment sum)
    # wpr1_ref: (10, 10)  fused  p_table @ Wr1
    # br1_ref : (1, 10)   rho first bias
    # wr3t_ref: (1, 10)   rho second weight, transposed to a lane row
    # br3_ref : (1, 1)    rho second bias
    # out_ref : (TB, 1)   one scalar per set in the tile
    rows = x_ref.shape[0]
    x = x_ref[...]                                                   # (rows, 1) int32

    # One-hot digit indicator (VPU compare).  Out-of-range (-1) rows are all-zero.
    classes = jax.lax.broadcasted_iota(jnp.int32, (rows, 10), 1)     # (rows, 10)
    onehot = (x == classes).astype(jnp.float32)                      # (rows, 10)

    # Per-set digit counts via a block-diagonal segment-sum matmul (MXU #1).
    counts = jnp.dot(s_ref[...], onehot,
                     preferred_element_type=jnp.float32)             # (TB, 10)

    # counts @ (p_table @ Wr1) + br1, ReLU  ==  rho.f2(rho.f1(sum_n phi(x_n)))  (MXU #2).
    r = jnp.maximum(
        jnp.dot(counts, wpr1_ref[...],
                preferred_element_type=jnp.float32) + br1_ref[...], 0.0)   # (TB, 10)

    # Final Linear(10, 1) on VPU (multiply) + XLU (lane reduce) — no MXU pass.
    # NOTE: last-dim-1 output means a masked store; acceptable here (tiny, not
    # store-bound).  For very large batches, emit a lane-dense slab instead.
    out_ref[...] = jnp.sum(r * wr3t_ref[...], axis=1, keepdims=True) + br3_ref[...]


def make_params(embed_size: int, key):
    ks = jax.random.split(key, 9)
    scale = 0.1
    return {
        "emb": scale * jax.random.normal(ks[0], (10, embed_size), jnp.float32),
        # phi.f2: Linear(embed_size, 50)   (stored transposed: (in, out))
        "w2": scale * jax.random.normal(ks[1], (embed_size, 50), jnp.float32),
        "b2": scale * jax.random.normal(ks[2], (1, 50), jnp.float32),
        # phi.f4: Linear(50, 10)
        "w4": scale * jax.random.normal(ks[3], (50, 10), jnp.float32),
        "b4": scale * jax.random.normal(ks[4], (1, 10), jnp.float32),
        # rho.f1: Linear(10, 10)
        "wr1": scale * jax.random.normal(ks[5], (10, 10), jnp.float32),
        "br1": scale * jax.random.normal(ks[6], (1, 10), jnp.float32),
        # rho.f3: Linear(10, 1)
        "wr3": scale * jax.random.normal(ks[7], (10, 1), jnp.float32),
        "br3": scale * jax.random.normal(ks[8], (1, 1), jnp.float32),
    }


def digit_sum_text_batched(x_sets, params, *, sets_per_tile: int = 8):
    """x_sets: (B, N) int32 digits in [0, 10).  Returns (B,) float32 (one scalar per set)."""
    x_sets = jnp.asarray(x_sets, jnp.int32)
    if x_sets.ndim == 1:
        x_sets = x_sets[None, :]
    B, N = x_sets.shape
    TB = sets_per_tile

    # Pad N to a sublane multiple and B to a full tile; sentinel -1 -> zero one-hot row.
    N_pad = ((N + 7) // 8) * 8
    B_pad = ((B + TB - 1) // TB) * TB
    x_p = jnp.full((B_pad, N_pad), -1, jnp.int32).at[:B, :N].set(x_sets)
    rows = TB * N_pad
    x_flat = x_p.reshape(B_pad * N_pad, 1)

    # ---- parameter-only fusion (exact, done once outside the kernel) -------
    # p_table[d] = phi(d) = relu(relu(emb[d] @ W2 + b2) @ W4 + b4)   -> (10, 10)
    p_table = jnp.maximum(
        jnp.maximum(params["emb"] @ params["w2"] + params["b2"], 0.0)
        @ params["w4"] + params["b4"], 0.0)
    w_pr1 = p_table @ params["wr1"]            # (10, 10): fold rho.f1 into the table
    wr3_t = params["wr3"].T                    # (1, 10): lane row for the VPU reduce

    # Block-diagonal summation matrix: S[b, b*N_pad + n] = 1  =>  counts = S @ onehot.
    seg = jnp.repeat(jnp.arange(TB, dtype=jnp.int32), N_pad)            # (rows,)
    S = (seg[None, :] == jnp.arange(TB, dtype=jnp.int32)[:, None]).astype(jnp.float32)

    num_tiles = B_pad // TB
    out = pl.pallas_call(
        digit_sum_kernel,
        out_shape=jax.ShapeDtypeStruct((B_pad, 1), jnp.float32),
        grid_spec=pltpu.PrefetchScalarGridSpec(
            num_scalar_prefetch=0,
            grid=(num_tiles,),
            in_specs=[
                pl.BlockSpec((rows, 1), lambda i: (i, 0)),      # digits for this tile
                pl.BlockSpec((TB, rows), lambda i: (0, 0)),     # S        (resident)
                pl.BlockSpec((10, 10), lambda i: (0, 0)),       # W_pr1    (resident)
                pl.BlockSpec((1, 10), lambda i: (0, 0)),        # br1      (resident)
                pl.BlockSpec((1, 10), lambda i: (0, 0)),        # wr3^T    (resident)
                pl.BlockSpec((1, 1), lambda i: (0, 0)),         # br3      (resident)
            ],
            out_specs=pl.BlockSpec((TB, 1), lambda i: (i, 0)),
        ),
        compiler_params=pltpu.CompilerParams(
            dimension_semantics=("parallel",)),                 # 2 TCs on v7x
    )(x_flat, S, w_pr1, params["br1"], wr3_t, params["br3"])
    return out[:B, 0]


def digit_sum_text(x_ids, params):
    """Single set, matching the PyTorch module's forward: (N,) digits -> (1,) float32."""
    return digit_sum_text_batched(x_ids[None, :], params)


def digit_sum_text_ref(x_ids, params):
    """Pure-JAX unfused reference of the PyTorch forward pass (correctness check)."""
    e = params["emb"][x_ids]                                   # Embedding lookup (N, E)
    h = jnp.maximum(e @ params["w2"] + params["b2"], 0.0)      # (N, 50)
    p = jnp.maximum(h @ params["w4"] + params["b4"], 0.0)      # (N, 10)
    agg = jnp.sum(p, axis=0, keepdims=True)                    # (1, 10)
    r = jnp.maximum(agg @ params["wr1"] + params["br1"], 0.0)  # (1, 10)
    return (r @ params["wr3"] + params["br3"]).reshape(1)      # (1,)


if __name__ == "__main__":
    key = jax.random.PRNGKey(0)
    k_param, k_data = jax.random.split(key)

    embed_size = 32
    batch = 4      # number of digit sets processed in one pallas_call
    set_size = 8   # digits per set
    params = make_params(embed_size, k_param)
    x_sets = jax.random.randint(k_data, (batch, set_size), 0, 10, dtype=jnp.int32)

    out = jax.block_until_ready(digit_sum_text_batched(x_sets, params))
    ref = jnp.stack([digit_sum_text_ref(x_sets[b], params)[0] for b in range(batch)])
    ref = jax.block_until_ready(ref)
    assert out.shape == (batch,) and out.dtype == jnp.float32
    assert jnp.allclose(out, ref, atol=1e-4, rtol=1e-4), (out, ref)

    # Single-set path (the PyTorch module's forward signature).
    out1 = jax.block_until_ready(digit_sum_text(x_sets[0], params))
    assert out1.shape == (1,)
    assert jnp.allclose(out1, ref[0], atol=1e-4, rtol=1e-4), (out1, ref[0])

    print("KERNEL_OK")
</pallas_src>

<mosaic_0001>
module attributes {stable_mosaic.version = 11 : i64} {
  func.func @digit_sum_kernel(%arg0: i32, %arg1: memref<64x1xi32, #tpu.memory_space<vmem>>, %arg2: memref<8x64xf32, #tpu.memory_space<vmem>>, %arg3: memref<10x10xf32, #tpu.memory_space<vmem>>, %arg4: memref<1x10xf32, #tpu.memory_space<vmem>>, %arg5: memref<1x10xf32, #tpu.memory_space<vmem>>, %arg6: memref<1x1xf32, #tpu.memory_space<vmem>>, %arg7: memref<8x1xf32, #tpu.memory_space<vmem>>) attributes {dimension_semantics = [#tpu.dimension_semantics<parallel>], iteration_bounds = array<i64: 1>, scalar_prefetch = 0 : i64, scratch_operands = 0 : i64, tpu.core_type = #tpu.core_type<tc>, window_params = [{transform_indices = @transform_0, window_bounds = array<i64: 64, 1>}, {pipeline_mode = #tpu.pipeline_mode<synchronous>, transform_indices = @transform_1, window_bounds = array<i64: 8, 64>}, {pipeline_mode = #tpu.pipeline_mode<synchronous>, transform_indices = @transform_2, window_bounds = array<i64: 10, 10>}, {pipeline_mode = #tpu.pipeline_mode<synchronous>, transform_indices = @transform_3, window_bounds = array<i64: 1, 10>}, {pipeline_mode = #tpu.pipeline_mode<synchronous>, transform_indices = @transform_4, window_bounds = array<i64: 1, 10>}, {pipeline_mode = #tpu.pipeline_mode<synchronous>, transform_indices = @transform_5, window_bounds = array<i64: 1, 1>}, {transform_indices = @transform_6, window_bounds = array<i64: 8, 1>}]} {
    %c0 = arith.constant 0 : index
    %c0_0 = arith.constant 0 : index
    %0 = vector.load %arg1[%c0, %c0_0] : memref<64x1xi32, #tpu.memory_space<vmem>>, vector<64x1xi32>
    %1 = tpu.iota {dimensions = array<i32: 1>} : vector<64x10xi32>
    %2 = vector.broadcast %0 : vector<64x1xi32> to vector<64x10xi32>
    %3 = arith.cmpi eq, %2, %1 : vector<64x10xi32>
    %4 = arith.extui %3 : vector<64x10xi1> to vector<64x10xi32>
    %5 = arith.sitofp %4 : vector<64x10xi32> to vector<64x10xf32>
    %c0_1 = arith.constant 0 : index
    %c0_2 = arith.constant 0 : index
    %6 = vector.load %arg2[%c0_1, %c0_2] : memref<8x64xf32, #tpu.memory_space<vmem>>, vector<8x64xf32>
    %cst = arith.constant dense<0.000000e+00> : vector<8x10xf32>
    %7 = tpu.matmul %6, %5, %cst {dimension_numbers = #tpu.dot_dimension_numbers<[1], [0], [0], [1], [0, 0, 1, 1], [], []>} : vector<8x64xf32>, vector<64x10xf32>, vector<8x10xf32> -> vector<8x10xf32>
    %c0_3 = arith.constant 0 : index
    %c0_4 = arith.constant 0 : index
    %8 = vector.load %arg3[%c0_3, %c0_4] : memref<10x10xf32, #tpu.memory_space<vmem>>, vector<10x10xf32>
    %cst_5 = arith.constant dense<0.000000e+00> : vector<8x10xf32>
    %9 = tpu.matmul %7, %8, %cst_5 {dimension_numbers = #tpu.dot_dimension_numbers<[1], [0], [0], [1], [0, 0, 1, 1], [], []>} : vector<8x10xf32>, vector<10x10xf32>, vector<8x10xf32> -> vector<8x10xf32>
    %c0_6 = arith.constant 0 : index
    %c0_7 = arith.constant 0 : index
    %10 = vector.load %arg4[%c0_6, %c0_7] : memref<1x10xf32, #tpu.memory_space<vmem>>, vector<1x10xf32>
    %11 = vector.broadcast %10 : vector<1x10xf32> to vector<8x10xf32>
    %12 = arith.addf %9, %11 : vector<8x10xf32>
    %cst_8 = arith.constant 0.000000e+00 : f32
    %13 = vector.broadcast %cst_8 : f32 to vector<8x10xf32>
    %14 = arith.maximumf %12, %13 : vector<8x10xf32>
    %c0_9 = arith.constant 0 : index
    %c0_10 = arith.constant 0 : index
    %15 = vector.load %arg5[%c0_9, %c0_10] : memref<1x10xf32, #tpu.memory_space<vmem>>, vector<1x10xf32>
    %16 = vector.broadcast %15 : vector<1x10xf32> to vector<8x10xf32>
    %17 = arith.mulf %14, %16 : vector<8x10xf32>
    %cst_11 = arith.constant dense<0.000000e+00> : vector<8xf32>
    %18 = vector.multi_reduction <add>, %17, %cst_11 [1] : vector<8x10xf32> to vector<8xf32>
    %19 = vector.shape_cast %18 : vector<8xf32> to vector<8x1xf32>
    %c0_12 = arith.constant 0 : index
    %c0_13 = arith.constant 0 : index
    %20 = vector.load %arg6[%c0_12, %c0_13] : memref<1x1xf32, #tpu.memory_space<vmem>>, vector<1x1xf32>
    %21 = vector.broadcast %20 : vector<1x1xf32> to vector<8x1xf32>
    %22 = arith.addf %19, %21 : vector<8x1xf32>
    %c0_14 = arith.constant 0 : index
    %c0_15 = arith.constant 0 : index
    %23 = vector.load %arg7[%c0_14, %c0_15] : memref<8x1xf32, #tpu.memory_space<vmem>>, vector<8x1xf32>
    tpu.vector_store %arg7[%c0_14, %c0_15], %22 {strides = array<i32>} : memref<8x1xf32, #tpu.memory_space<vmem>>, vector<8x1xf32>,
    return
  }
  func.func @transform_0(%arg0: i32) -> (i32, i32) {
    %c0_i32 = arith.constant 0 : i32
    %c0_i32_0 = arith.constant 0 : i32
    return %arg0, %c0_i32 : i32, i32
  }
  func.func @transform_1(%arg0: i32) -> (i32, i32) {
    %c0_i32 = arith.constant 0 : i32
    %c0_i32_0 = arith.constant 0 : i32
    %c0_i32_1 = arith.constant 0 : i32
    return %c0_i32, %c0_i32_0 : i32, i32
  }
  func.func @transform_2(%arg0: i32) -> (i32, i32) {
    %c0_i32 = arith.constant 0 : i32
    %c0_i32_0 = arith.constant 0 : i32
    %c0_i32_1 = arith.constant 0 : i32
    return %c0_i32, %c0_i32_0 : i32, i32
  }
  func.func @transform_3(%arg0: i32) -> (i32, i32) {
    %c0_i32 = arith.constant 0 : i32
    %c0_i32_0 = arith.constant 0 : i32
    %c0_i32_1 = arith.constant 0 : i32
    return %c0_i32, %c0_i32_0 : i32, i32
  }
  func.func @transform_4(%arg0: i32) -> (i32, i32) {
    %c0_i32 = arith.constant 0 : i32
    %c0_i32_0 = arith.constant 0 : i32
    %c0_i32_1 = arith.constant 0 : i32
    return %c0_i32, %c0_i32_0 : i32, i32
  }
  func.func @transform_5(%arg0: i32) -> (i32, i32) {
    %c0_i32 = arith.constant 0 : i32
    %c0_i32_0 = arith.constant 0 : i32
    %c0_i32_1 = arith.constant 0 : i32
    return %c0_i32, %c0_i32_0 : i32, i32
  }
  func.func @transform_6(%arg0: i32) -> (i32, i32) {
    %c0_i32 = arith.constant 0 : i32
    %c0_i32_0 = arith.constant 0 : i32
    return %arg0, %c0_i32 : i32, i32
  }
}

</mosaic_0001>

<bundles_post_ra>
// kernel: tpu_custom_call.1
= control target key start
LH: loop header
LB: loop body
LE: loop exit
PB: predicated region body
PF: predicated region fallthrough
CT: control target
= control target key end

     0   :  { %v337_v0 = vmov 0   ;;  %v338_v5 = vmov 0.0   ;;  %vm339_vm0 = vmmov 0   ;;  %vm171_vm1 = vcmask 1041408   ;;  %s423_s0 = inlined_call_operand.vmem [shape: s32[64,1], index: 0, kind: input, shape index: {}]   ;;  %s424_s2 = inlined_call_operand.vmem [shape: f32[10,10], index: 2, kind: input, shape index: {}]   ;;  %s425_s1 = inlined_call_operand.vmem [shape: f32[8,64], index: 1, kind: input, shape index: {}]   ;;  %s426_s5 = inlined_call_operand.<no memory space> [shape: f32[1,1], index: 5, kind: input, shape index: {}]   ;;  %s427_s3 = inlined_call_operand.vmem [shape: f32[1,10], index: 3, kind: input, shape index: {}]   ;;  %s428_s4 = inlined_call_operand.vmem [shape: f32[1,10], index: 4, kind: input, shape index: {}]   ;;  %s429_s6 = inlined_call_operand.vmem [shape: f32[8,1], index: 6, kind: output, shape index: {}]  }
   0x1   :  { %336 = vset.pattern.permute.xlu1 %v337_v0  ;;  %335 = vset.pattern.permute.xlu0 %v337_v0  ;;  %v32_v1 = vld [vmem:[%s423_s0 + $0x38] sm:$0xff]  ;;  %v30_v2 = vld [vmem:[%s423_s0 + $0x28] sm:$0xff]  ;;  %v31_v3 = vld [vmem:[%s423_s0 + $0x30] sm:$0xff]  ;;  %v33_v11 = vlaneseq  ;;  %v340_v15 = vmov 1.0   ;;  %vm84_vm9 = vcmask 523264   ;;  %vm167_vm11 = vcmask 80896  }
   0x2   :  { %57 = vperm.xlu0 %335, %v32_v1   ;;  %51 = vperm.xlu1 %336, %v30_v2   ;;  %v29_v4 = vld [vmem:[%s423_s0 + $0x20] sm:$0xff]  ;;  %v28_v6 = vld [vmem:[%s423_s0 + $0x18] sm:$0xff]  ;;  %v27_v7 = vld [vmem:[%s423_s0 + $0x10] sm:$0xff]  ;;  %v11_v26 = vstv %s426_s5  ;;  %vm265_vm12 = vcmask 7168  }
   0x3   :  { %305 = vmatprep.subr.mxu0 %v338_v5  ;;  %324 = vmatprep.subr.mxu1 %v338_v5  ;;  %v26_v8 = vld [vmem:[%s423_s0 + $0x8] sm:$0xff]  ;;  %v25_v9 = vld [vmem:[%s423_s0] sm:$0xff]  ;;  %v34_v12 = vand.u32 127, %v33_v11  ;;  %12 = vst [vmem:[#allocation2] sm:$0x1] %v11_v26 }
   0x4   :  { %321 = vmatprep.mubr.msk.f32.mxu0 %vm339_vm0, %v338_v5  ;;  %328 = vmatprep.mubr.msk.f32.mxu1 %vm339_vm0, %v338_v5  ;;  %v159_v10 = vld [vmem:[%s424_s2 + $0x8] sm:$0x3]  ;;  %v83_v22 = vld [vmem:[%s425_s1] sm:$0xff] }
   0x5   :  { %325 = vmatpush3.msk.msra.mxu1 %vm171_vm1, %v159_v10  ;;  %v158_v23 = vld [vmem:[%s424_s2] sm:$0xff] }
   0x6   :  { %54 = vperm.xlu0 %335, %v31_v3   ;;  %48 = vperm.xlu1 %336, %v29_v4   ;;  %v288_v27 = vld [vmem:[%s427_s3] ss:$0 sm:$0xff] }
   0x7   :  { %326 = vmatprep.subr.mxu1 %v338_v5  ;;  %v291_v31 = vld [vmem:[%s428_s4] ss:$0 sm:$0xff] }
   0x8   :  { %327 = vmatpush3.msra.mxu1 %v158_v23 }
   0xa   :  { %45 = vperm.xlu0 %335, %v28_v6   ;;  %42 = vperm.xlu1 %336, %v27_v7   ;;  %v292_v35 = vld [vmem:[#allocation2] ss:$0 sm:$0xff] }
   0xe   :  { %39 = vperm.xlu0 %335, %v26_v8   ;;  %36 = vperm.xlu1 %336, %v25_v9  }
  0x7d   :  { %v58_v13 = vpop.permute.xlu0 %57  ;;  %v52_v14 = vpop.permute.xlu1 %51 }
  0x7e   :  { %vm66_vm2 = vcmp.eq.s32.totalorder %v58_v13, %v34_v12  ;;  %vm64_vm4 = vcmp.eq.s32.totalorder %v52_v14, %v34_v12 }
  0x7f   :  { %306 = vmatpush3.msk.msra.mxu0 %vm66_vm2, %v340_v15 }
  0x80   :  { %307 = vmatprep.subr.mxu0 %v338_v5 }
  0x81   :  { %v55_v16 = vpop.permute.xlu0 %54  ;;  %v49_v17 = vpop.permute.xlu1 %48 }
  0x82   :  { %vm65_vm3 = vcmp.eq.s32.totalorder %v55_v16, %v34_v12  ;;  %vm63_vm5 = vcmp.eq.s32.totalorder %v49_v17, %v34_v12 }
  0x83   :  { %308 = vmatpush3.msk.msra.mxu0 %vm65_vm3, %v340_v15 }
  0x84   :  { %309 = vmatprep.subr.mxu0 %v338_v5 }
  0x85   :  { %310 = vmatpush3.msk.msra.mxu0 %vm64_vm4, %v340_v15  ;;  %v46_v18 = vpop.permute.xlu0 %45  ;;  %v43_v19 = vpop.permute.xlu1 %42 }
  0x86   :  { %311 = vmatprep.subr.mxu0 %v338_v5  ;;  %vm62_vm6 = vcmp.eq.s32.totalorder %v46_v18, %v34_v12  ;;  %vm61_vm7 = vcmp.eq.s32.totalorder %v43_v19, %v34_v12 }
  0x87   :  { %312 = vmatpush3.msk.msra.mxu0 %vm63_vm5, %v340_v15 }
  0x88   :  { %313 = vmatprep.subr.mxu0 %v338_v5 }
  0x89   :  { %314 = vmatpush3.msk.msra.mxu0 %vm62_vm6, %v340_v15  ;;  %v40_v20 = vpop.permute.xlu0 %39  ;;  %v37_v21 = vpop.permute.xlu1 %36 }
  0x8a   :  { %315 = vmatprep.subr.mxu0 %v338_v5  ;;  %vm60_vm8 = vcmp.eq.s32.totalorder %v40_v20, %v34_v12  ;;  %vm59_vm10 = vcmp.eq.s32.totalorder %v37_v21, %v34_v12 }
  0x8b   :  { %316 = vmatpush3.msk.msra.mxu0 %vm61_vm7, %v340_v15 }
  0x8c   :  { %317 = vmatprep.subr.mxu0 %v338_v5 }
  0x8d   :  { %318 = vmatpush3.msk.msra.mxu0 %vm60_vm8, %v340_v15 }
  0x8e   :  { %319 = vmatprep.subr.mxu0 %v338_v5 }
  0x8f   :  { %320 = vmatpush3.msk.msra.mxu0 %vm59_vm10, %v340_v15 }
  0x90   :  { %322 = vmatmul.mubr.msk.f32.vlgmr.msra.gmra.mxu0 %vm84_vm9, %v83_v22 }
 0x150   :  { %v154_v24 = vpop.f32.mrf.mxu0 }
 0x151   :  { %329 = vmatmul.mubr.msk.f32.vlgmr.msra.gmra.mxu1 %vm167_vm11, %v154_v24 }
 0x152   :  { %v323_v25 = vpop.f32.mrf.mxu0 }
 0x211   :  { %v241_v28 = vpop.f32.mrf.mxu1 }
 0x212   :  { %v242_v29 = vadd.f32 %v288_v27, %v241_v28 }
 0x213   :  { %v330_v30 = vpop.f32.mrf.mxu1 }
 0x214   :  { %v245_v32 = vmax.f32 %v242_v29, 0.0 }
 0x216   :  { %v253_v33 = vmul.f32 %v291_v31, %v245_v32 }
 0x218   :  { %v254_v34 = vsel %vm167_vm11, %v253_v33, 0.0 }
 0x219   :  { %255 = vadd.xlane.f32.xlu0 %v254_v34 }
 0x2a2   :  { %v256_v36 = vpop.xlane.xlu0 %255 }
 0x2a3   :  { %v264_v37 = vadd.f32 %v292_v35, %v256_v36 }
 0x2a5   :  { %266 = vst.msk [vmem:[%s429_s6] sm:$0xff] %vm265_vm12, %v264_v37 }

</bundles_post_ra>
